<compile_context>
chip_gen: v5e
topology: v5e:2x2
jax: 0.10.0
libtpu: 0.0.40
codegen_flags: <defaults>
</compile_context>

<pallas_src>
import functools

import jax
import jax.numpy as jnp
import numpy as np
from jax import lax
from jax.experimental import pallas as pl
from jax.experimental.pallas import tpu as pltpu


TB = 8  # batch rows per grid step -> full (8,128) sublane tile on the output


# ----------------------------------------------------------------------------
# Pallas kernel: chunked patch-embed matmul -> in-kernel mean pool -> Linear
# ----------------------------------------------------------------------------
def _vcm_kernel(ch, x_ref, wp_ref, wc_ref, bc_ref, out_ref, acc_ref):
    # Grid = (B_pad//TB, NT).  Per step:
    #   x_ref   : [TB, TNP, Dp_pad] bf16 patches (batch tile b, patch tile t)
    #   wp_ref  : [Dp_pad, F_pad]   bf16 patch-embedding weight (resident)
    #   wc_ref  : [F_pad, Cn_pad]   bf16 classifier weight * 1/NP (resident)
    #   bc_ref  : [1, Cn_pad]       f32  classifier bias (resident)
    #   out_ref : [TB, Cn_pad]      f32  logits for this batch tile
    #   acc_ref : [TB, F_pad]       f32  running patch-sum accumulator
    t = pl.program_id(1)
    tb, tnp, dp = x_ref.shape
    f = wp_ref.shape[1]
    n_chunks = tnp // ch

    @pl.when(t == 0)
    def _init():
        acc_ref[...] = jnp.zeros_like(acc_ref)

    # Patch embedding on the MXU, chunked along the patch axis so the live
    # f32 result slab is bounded at (TB*ch, F_pad) while M = TB*ch (>=256 at
    # production ViT shapes for the 256-wide v6e/v7x MXU).
    def _chunk(c, carry):
        start = pl.multiple_of(c * ch, ch)
        xc = x_ref[:, pl.ds(start, ch), :]                       # (TB, ch, Dp)
        h = jnp.dot(xc.reshape(tb * ch, dp), wp_ref[...],
                    preferred_element_type=jnp.float32)          # (TB*ch, F)
        # Mean pool as an XLU reduction (the 1/NP scale is folded into wc).
        acc_ref[...] += jnp.sum(h.reshape(tb, ch, f), axis=1)
        return carry

    if n_chunks == 1:
        _chunk(0, 0)
    else:
        lax.fori_loop(0, n_chunks, _chunk, 0, unroll=True)

    @pl.when(t == pl.num_programs(1) - 1)
    def _epilogue():
        fea = acc_ref[...]            # f32 patch sum (== featurizer .float())
        # Classifier on the MXU with bf16 operands, f32 accumulation.
        # wc is pre-scaled by 1/NP, so this computes mean-pool @ Wc + b.
        logits = jnp.dot(fea.astype(jnp.bfloat16), wc_ref[...],
                         preferred_element_type=jnp.float32)
        out_ref[...] = logits + bc_ref[...]


# ----------------------------------------------------------------------------
# Host-side helpers
# ----------------------------------------------------------------------------
def _round_up(n, m):
    return ((n + m - 1) // m) * m


def _pick_chunk(tnp, tb):
    """Largest multiple-of-8 divisor of tnp with tb*chunk <= ~256 (MXU M)."""
    c = min(tnp, max(8, 256 // tb))
    while c > 8 and tnp % c != 0:
        c -= 8
    return c


def _vmem_budget_bytes():
    """Per-generation VMEM budget (v5e/v6e: 128 MiB; v7x: 64 MiB per TC)."""
    try:
        phys = int(pltpu.get_tpu_info().vmem_capacity_bytes)
    except Exception:
        phys = 64 * 1024 * 1024  # conservative default (v7x per-core VMEM)
    return max(32 * 1024 * 1024, (phys * 3) // 4)


# ----------------------------------------------------------------------------
# Forward pass
# ----------------------------------------------------------------------------
@functools.partial(jax.jit, static_argnames=("patch",))
def visual_classify_forward(images, w_patch, w_cls, b_cls, *, patch):
    """images: [B, C, H, W] float32.  Returns logits [B, class_num] float32."""
    B, C, H, W = images.shape
    P = patch
    Hp, Wp = H // P, W // P
    NP = Hp * Wp
    Dp = C * P * P
    F = w_patch.shape[1]
    Cn = w_cls.shape[1]

    # --- glue (fused under jit): NCHW -> [B, NP, Dp] patch tensor ----------
    # TODO(synk): gather patches straight from NCHW inside the kernel via a
    # (b, hp, wp) index_map to remove this HBM round-trip entirely.
    x = images.reshape(B, C, Hp, P, Wp, P)
    x = jnp.transpose(x, (0, 2, 4, 1, 3, 5)).reshape(B, NP, Dp)

    # Lane/sublane-friendly padded sizes (all matmuls + stores lane-dense).
    Dp_pad = _round_up(Dp, 128)
    F_pad = _round_up(F, 128)
    Cn_pad = _round_up(Cn, 128)
    B_pad = _round_up(B, TB)

    # Patch-tile size: 128 at ViT scale, else the (8-padded) whole patch axis.
    # Zero patch padding is exact: zero rows add nothing to the pooled sum and
    # the scale uses the true 1/NP.
    TNP = 128 if NP >= 128 else _round_up(NP, 8)
    CH = _pick_chunk(TNP, TB)
    budget = _vmem_budget_bytes()

    def _step_bytes(tnp, ch):
        x_dbuf = 2 * TB * tnp * Dp_pad * 2                          # bf16, 2-deep
        w_res = (Dp_pad * F_pad + F_pad * Cn_pad) * 2 + Cn_pad * 4  # 1-buffered
        live = (TB * F_pad + TB * ch * F_pad) * 4 + 2 * TB * Cn_pad * 4
        return x_dbuf + w_res + live

    # VMEM gate (matters on v7x's 64 MiB/TC): shrink the patch tile if the
    # double-buffered x + resident weights + live slabs would not fit.
    while TNP % 16 == 0 and _step_bytes(TNP, CH) > budget:
        TNP //= 2
        CH = _pick_chunk(TNP, TB)

    NP_pad = _round_up(NP, TNP)
    NT = NP_pad // TNP

    # bf16 MXU inputs; zero-pad batch / patch / lane dims in one pad each.
    x = jnp.pad(x.astype(jnp.bfloat16),
                ((0, B_pad - B), (0, NP_pad - NP), (0, Dp_pad - Dp)))
    wp = jnp.pad(w_patch.astype(jnp.bfloat16),
                 ((0, Dp_pad - Dp), (0, F_pad - F)))
    # Fold the mean-pool 1/NP into the classifier weight (deliberate bf16
    # numerics tradeoff for the classifier matmul).
    wc = jnp.pad((w_cls * (1.0 / float(NP))).astype(jnp.bfloat16),
                 ((0, F_pad - F), (0, Cn_pad - Cn)))
    bc = jnp.pad(b_cls.astype(jnp.float32).reshape(1, Cn),
                 ((0, 0), (0, Cn_pad - Cn)))

    kernel = functools.partial(_vcm_kernel, CH)
    resident = dict(pipeline_mode=pl.Buffered(1))  # constant index_map

    out = pl.pallas_call(
        kernel,
        out_shape=jax.ShapeDtypeStruct((B_pad, Cn_pad), jnp.float32),
        grid_spec=pltpu.PrefetchScalarGridSpec(
            num_scalar_prefetch=0,
            grid=(B_pad // TB, NT),
            in_specs=[
                pl.BlockSpec((TB, TNP, Dp_pad), lambda b, t: (b, t, 0)),
                pl.BlockSpec((Dp_pad, F_pad), lambda b, t: (0, 0), **resident),
                pl.BlockSpec((F_pad, Cn_pad), lambda b, t: (0, 0), **resident),
                pl.BlockSpec((1, Cn_pad), lambda b, t: (0, 0), **resident),
            ],
            out_specs=pl.BlockSpec((TB, Cn_pad), lambda b, t: (b, 0)),
            scratch_shapes=[pltpu.VMEM((TB, F_pad), jnp.float32)],
        ),
        compiler_params=pltpu.CompilerParams(
            # Batch-tile axis is independent -> parallel (2-TC sharding on
            # v7x when B_pad//TB >= 2); patch-tile axis is the reduction into
            # the scratch accumulator -> arbitrary.
            dimension_semantics=("parallel", "arbitrary"),
            vmem_limit_bytes=int(budget),
        ),
    )(x, wp, wc, bc)

    return out[:B, :Cn]


# ----------------------------------------------------------------------------
# Pure-JAX f32 reference for a correctness check
# ----------------------------------------------------------------------------
def _reference(images, w_patch, w_cls, b_cls, patch):
    B, C, H, W = images.shape
    P = patch
    NP = (H // P) * (W // P)
    Dp = C * P * P
    x = images.reshape(B, C, H // P, P, W // P, P)
    x = jnp.transpose(x, (0, 2, 4, 1, 3, 5)).reshape(B, NP, Dp)
    fea = jnp.mean(jnp.einsum("bnd,df->bnf", x, w_patch), axis=1)
    fea = fea.astype(jnp.float32)
    return fea @ w_cls + b_cls[None, :]


if __name__ == "__main__":
    # Small shapes consistent with the forward pass.
    B, C, H, W = 2, 4, 16, 16
    PATCH = 8
    FEA_LEN = 32      # fea_len
    CLASS_NUM = 10    # class_num
    Dp = C * PATCH * PATCH

    key = jax.random.PRNGKey(0)
    k1, k2, k3, k4 = jax.random.split(key, 4)
    images = jax.random.normal(k1, (B, C, H, W), dtype=jnp.float32)

    # Deterministic synthetic parameters (featurizer patch-proj + classifier).
    w_patch = jax.random.normal(k2, (Dp, FEA_LEN), dtype=jnp.float32) * 0.02
    # nn.Linear(fea_len, class_num): weight [class_num, fea_len], bias [class_num]
    w_cls_t = jax.random.normal(k3, (CLASS_NUM, FEA_LEN), dtype=jnp.float32) * 0.1
    b_cls = jax.random.normal(k4, (CLASS_NUM,), dtype=jnp.float32) * 0.1
    w_cls = w_cls_t.T  # kernel computes fea @ W^T + b

    logits = visual_classify_forward(images, w_patch, w_cls, b_cls, patch=PATCH)
    logits = jax.block_until_ready(logits)

    ref = _reference(images, w_patch, w_cls, b_cls, PATCH)
    # bf16 featurizer + classifier MXU operands (f32 accumulation) loosen the
    # tolerance slightly; this is a documented, deliberate numerics tradeoff.
    np.testing.assert_allclose(np.asarray(logits), np.asarray(ref),
                               rtol=1e-2, atol=1e-2)
    print("KERNEL_OK")
</pallas_src>

<mosaic_0001>
module attributes {stable_mosaic.version = 11 : i64} {
  func.func @_vcm_kernel(%arg0: i32, %arg1: i32, %arg2: memref<8x8x256xbf16, #tpu.memory_space<vmem>>, %arg3: memref<256x128xbf16, #tpu.memory_space<vmem>>, %arg4: memref<128x128xbf16, #tpu.memory_space<vmem>>, %arg5: memref<1x128xf32, #tpu.memory_space<vmem>>, %arg6: memref<8x128xf32, #tpu.memory_space<vmem>>, %arg7: memref<8x128xf32, #tpu.memory_space<vmem>>) attributes {dimension_semantics = [#tpu.dimension_semantics<parallel>, #tpu.dimension_semantics<arbitrary>], iteration_bounds = array<i64: 1, 1>, scalar_prefetch = 0 : i64, scratch_operands = 1 : i64, tpu.core_type = #tpu.core_type<tc>, window_params = [{transform_indices = @transform_0, window_bounds = array<i64: 8, 8, 256>}, {pipeline_mode = #tpu.pipeline_mode<synchronous>, transform_indices = @transform_1, window_bounds = array<i64: 256, 128>}, {pipeline_mode = #tpu.pipeline_mode<synchronous>, transform_indices = @transform_2, window_bounds = array<i64: 128, 128>}, {pipeline_mode = #tpu.pipeline_mode<synchronous>, transform_indices = @transform_3, window_bounds = array<i64: 1, 128>}, {transform_indices = @transform_4, window_bounds = array<i64: 8, 128>}]} {
    %c0_i32 = arith.constant 0 : i32
    %0 = arith.cmpi eq, %arg1, %c0_i32 : i32
    %1 = arith.extui %0 : i1 to i32
    %c0_i32_0 = arith.constant 0 : i32
    %2 = arith.cmpi ne, %1, %c0_i32_0 : i32
    scf.if %2 {
      %cst_12 = arith.constant 0.000000e+00 : f32
      %17 = vector.broadcast %cst_12 : f32 to vector<8x128xf32>
      %c0_13 = arith.constant 0 : index
      %c0_14 = arith.constant 0 : index
      %18 = vector.load %arg7[%c0_13, %c0_14] : memref<8x128xf32, #tpu.memory_space<vmem>>, vector<8x128xf32>
      tpu.vector_store %arg7[%c0_13, %c0_14], %17 {strides = array<i32>} : memref<8x128xf32, #tpu.memory_space<vmem>>, vector<8x128xf32>,
    } else {
    }
    %c0_i32_1 = arith.constant 0 : i32
    %3 = tpu.assume_multiple %c0_i32_1, 8 : i32
    %c0 = arith.constant 0 : index
    %4 = arith.index_cast %3 : i32 to index
    %c0_2 = arith.constant 0 : index
    %5 = vector.load %arg2[%c0, %4, %c0_2] : memref<8x8x256xbf16, #tpu.memory_space<vmem>>, vector<8x8x256xbf16>
    %6 = vector.shape_cast %5 : vector<8x8x256xbf16> to vector<64x256xbf16>
    %c0_3 = arith.constant 0 : index
    %c0_4 = arith.constant 0 : index
    %7 = vector.load %arg3[%c0_3, %c0_4] : memref<256x128xbf16, #tpu.memory_space<vmem>>, vector<256x128xbf16>
    %cst = arith.constant dense<0.000000e+00> : vector<64x128xf32>
    %8 = tpu.matmul %6, %7, %cst {dimension_numbers = #tpu.dot_dimension_numbers<[1], [0], [0], [1], [0, 0, 1, 1], [], []>} : vector<64x256xbf16>, vector<256x128xbf16>, vector<64x128xf32> -> vector<64x128xf32>
    %c0_5 = arith.constant 0 : index
    %c0_6 = arith.constant 0 : index
    %9 = vector.load %arg7[%c0_5, %c0_6] : memref<8x128xf32, #tpu.memory_space<vmem>>, vector<8x128xf32>
    %10 = vector.shape_cast %8 : vector<64x128xf32> to vector<8x8x128xf32>
    %cst_7 = arith.constant dense<0.000000e+00> : vector<8x128xf32>
    %11 = vector.multi_reduction <add>, %10, %cst_7 [1] : vector<8x8x128xf32> to vector<8x128xf32>
    %12 = arith.addf %9, %11 : vector<8x128xf32>
    %c0_8 = arith.constant 0 : index
    %c0_9 = arith.constant 0 : index
    %13 = vector.load %arg7[%c0_8, %c0_9] : memref<8x128xf32, #tpu.memory_space<vmem>>, vector<8x128xf32>
    tpu.vector_store %arg7[%c0_8, %c0_9], %12 {strides = array<i32>} : memref<8x128xf32, #tpu.memory_space<vmem>>, vector<8x128xf32>,
    %c0_i32_10 = arith.constant 0 : i32
    %14 = arith.cmpi eq, %arg1, %c0_i32_10 : i32
    %15 = arith.extui %14 : i1 to i32
    %c0_i32_11 = arith.constant 0 : i32
    %16 = arith.cmpi ne, %15, %c0_i32_11 : i32
    scf.if %16 {
      %c0_12 = arith.constant 0 : index
      %c0_13 = arith.constant 0 : index
      %17 = vector.load %arg7[%c0_12, %c0_13] : memref<8x128xf32, #tpu.memory_space<vmem>>, vector<8x128xf32>
      %18 = arith.truncf %17 : vector<8x128xf32> to vector<8x128xbf16>
      %c0_14 = arith.constant 0 : index
      %c0_15 = arith.constant 0 : index
      %19 = vector.load %arg4[%c0_14, %c0_15] : memref<128x128xbf16, #tpu.memory_space<vmem>>, vector<128x128xbf16>
      %cst_16 = arith.constant dense<0.000000e+00> : vector<8x128xf32>
      %20 = tpu.matmul %18, %19, %cst_16 {dimension_numbers = #tpu.dot_dimension_numbers<[1], [0], [0], [1], [0, 0, 1, 1], [], []>} : vector<8x128xbf16>, vector<128x128xbf16>, vector<8x128xf32> -> vector<8x128xf32>
      %c0_17 = arith.constant 0 : index
      %c0_18 = arith.constant 0 : index
      %21 = vector.load %arg5[%c0_17, %c0_18] : memref<1x128xf32, #tpu.memory_space<vmem>>, vector<1x128xf32>
      %22 = vector.broadcast %21 : vector<1x128xf32> to vector<8x128xf32>
      %23 = arith.addf %20, %22 : vector<8x128xf32>
      %c0_19 = arith.constant 0 : index
      %c0_20 = arith.constant 0 : index
      %24 = vector.load %arg6[%c0_19, %c0_20] : memref<8x128xf32, #tpu.memory_space<vmem>>, vector<8x128xf32>
      tpu.vector_store %arg6[%c0_19, %c0_20], %23 {strides = array<i32>} : memref<8x128xf32, #tpu.memory_space<vmem>>, vector<8x128xf32>,
    } else {
    }
    return
  }
  func.func @transform_0(%arg0: i32, %arg1: i32) -> (i32, i32, i32) {
    %c0_i32 = arith.constant 0 : i32
    %c0_i32_0 = arith.constant 0 : i32
    return %arg0, %arg1, %c0_i32 : i32, i32, i32
  }
  func.func @transform_1(%arg0: i32, %arg1: i32) -> (i32, i32) {
    %c0_i32 = arith.constant 0 : i32
    %c0_i32_0 = arith.constant 0 : i32
    %c0_i32_1 = arith.constant 0 : i32
    return %c0_i32, %c0_i32_0 : i32, i32
  }
  func.func @transform_2(%arg0: i32, %arg1: i32) -> (i32, i32) {
    %c0_i32 = arith.constant 0 : i32
    %c0_i32_0 = arith.constant 0 : i32
    %c0_i32_1 = arith.constant 0 : i32
    return %c0_i32, %c0_i32_0 : i32, i32
  }
  func.func @transform_3(%arg0: i32, %arg1: i32) -> (i32, i32) {
    %c0_i32 = arith.constant 0 : i32
    %c0_i32_0 = arith.constant 0 : i32
    %c0_i32_1 = arith.constant 0 : i32
    return %c0_i32, %c0_i32_0 : i32, i32
  }
  func.func @transform_4(%arg0: i32, %arg1: i32) -> (i32, i32) {
    %c0_i32 = arith.constant 0 : i32
    %c0_i32_0 = arith.constant 0 : i32
    return %arg0, %c0_i32 : i32, i32
  }
}

</mosaic_0001>

<bundles_post_ra>
// kernel: visual_classify_forward.1
= control target key start
LH: loop header
LB: loop body
LE: loop exit
PB: predicated region body
PF: predicated region fallthrough
CT: control target
= control target key end

     0   :  { %vm316_vm0 = vcmask 1041409   ;;  %vm318_vm1 = vcmask 1042434   ;;  %vm320_vm2 = vcmask 1043459   ;;  %vm322_vm3 = vcmask 1044484   ;;  %s752_s1 = inlined_call_operand.vmem [shape: bf16[256,128], index: 1, kind: input, shape index: {}]   ;;  %s753_s0 = inlined_call_operand.vmem [shape: bf16[8,8,256], index: 0, kind: input, shape index: {}]   ;;  %s754_s3 = inlined_call_operand.vmem [shape: f32[1,128], index: 3, kind: input, shape index: {}]   ;;  %s755_s2 = inlined_call_operand.vmem [shape: bf16[128,128], index: 2, kind: input, shape index: {}]   ;;  %s756_s4 = inlined_call_operand.vmem [shape: f32[8,128], index: 4, kind: output, shape index: {}]  }
   0x1   :  { %v567_v0 = vld [vmem:[%s752_s1 + $0x38] sm:$0xff]  ;;  %v566_v2 = vld [vmem:[%s752_s1 + $0x30] sm:$0xff]  ;;  %v565_v4 = vld [vmem:[%s752_s1 + $0x28] sm:$0xff]  ;;  %vm324_vm4 = vcmask 1045509   ;;  %vm326_vm5 = vcmask 1046534   ;;  %vm328_vm6 = vcmask 1047559  }
   0x2   :  { %v575_v1 = vld [vmem:[%s752_s1 + $0x78] sm:$0xff]  ;;  %201 = vmatpush.bf16.msra.mxu0 %v567_v0  ;;  %584 = vmatpush.bf16.msra.mxu3 %v567_v0  ;;  %v574_v3 = vld [vmem:[%s752_s1 + $0x70] sm:$0xff]  ;;  %v573_v5 = vld [vmem:[%s752_s1 + $0x68] sm:$0xff] }
   0x3   :  { %592 = vmatpush.bf16.msra.mxu1 %v575_v1  ;;  %v564_v6 = vld [vmem:[%s752_s1 + $0x20] sm:$0xff]  ;;  %v563_v8 = vld [vmem:[%s752_s1 + $0x18] sm:$0xff]  ;;  %v562_v10 = vld [vmem:[%s752_s1 + $0x10] sm:$0xff] }
   0x4   :  { %v572_v7 = vld [vmem:[%s752_s1 + $0x60] sm:$0xff]  ;;  %v571_v9 = vld [vmem:[%s752_s1 + $0x58] sm:$0xff]  ;;  %v570_v11 = vld [vmem:[%s752_s1 + $0x50] sm:$0xff] }
   0x5   :  { %v561_v12 = vld [vmem:[%s752_s1 + $0x8] sm:$0xff]  ;;  %v560_v14 = vld [vmem:[%s752_s1] sm:$0xff]  ;;  %v434_v15 = vld [vmem:[%s753_s0 + $0x10] sm:$0xf] }
   0x6   :  { %202 = vmatpush.bf16.msra.mxu0 %v566_v2  ;;  %585 = vmatpush.bf16.msra.mxu3 %v566_v2  ;;  %v569_v13 = vld [vmem:[%s752_s1 + $0x48] sm:$0xff]  ;;  %v555_v16 = vld [vmem:[%s753_s0 + $0x14] sm:$0xf0]  ;;  %v426_v17 = vld [vmem:[%s753_s0] sm:$0xf] }
   0x7   :  { %593 = vmatpush.bf16.msra.mxu1 %v574_v3  ;;  %v553_v18 = vld [vmem:[%s753_s0 + $0x4] sm:$0xf0]  ;;  %v568_v19 = vld [vmem:[%s752_s1 + $0x40] sm:$0xff]  ;;  %v554_v20 = vld [vmem:[%s753_s0 + $0x14] sm:$0xf]  ;;  %v435_v22 = vor.u32 %v555_v16, %v434_v15 }
   0x8   :  { %v436_v21 = vld [vmem:[%s753_s0 + $0x18] sm:$0xf0]  ;;  %v427_v23 = vor.u32 %v553_v18, %v426_v17  ;;  %v442_v25 = vld [vmem:[%s753_s0 + $0x20] sm:$0xf]  ;;  %v557_v26 = vld [vmem:[%s753_s0 + $0x24] sm:$0xf0] }
   0x9   :  { %v439_v24 = vor.u32 %v554_v20, %v436_v21  ;;  %v556_v27 = vld [vmem:[%s753_s0 + $0x24] sm:$0xf]  ;;  %v444_v28 = vld [vmem:[%s753_s0 + $0x28] sm:$0xf0]  ;;  %v443_v29 = vor.u32 %v557_v26, %v442_v25  ;;  %v450_v34 = vld [vmem:[%s753_s0 + $0x30] sm:$0xf] }
   0xa   :  { %203 = vmatpush.bf16.msra.mxu0 %v565_v4  ;;  %586 = vmatpush.bf16.msra.mxu3 %v565_v4  ;;  %v447_v30 = vor.u32 %v556_v27, %v444_v28  ;;  %v552_v31 = vld [vmem:[%s753_s0 + $0x4] sm:$0xf]  ;;  %v428_v32 = vld [vmem:[%s753_s0 + $0x8] sm:$0xf0]  ;;  %v559_v35 = vld [vmem:[%s753_s0 + $0x34] sm:$0xf0] }
   0xb   :  { %594 = vmatpush.bf16.msra.mxu1 %v573_v5  ;;  %v431_v33 = vor.u32 %v552_v31, %v428_v32  ;;  %v558_v36 = vld [vmem:[%s753_s0 + $0x34] sm:$0xf]  ;;  %v452_v37 = vld [vmem:[%s753_s0 + $0x38] sm:$0xf0]  ;;  %v451_v38 = vor.u32 %v559_v35, %v450_v34  ;;  %v581_v44 = vld [vmem:[%s755_s2 + $0x28] sm:$0xff] }
   0xc   :  { %v455_v39 = vor.u32 %v558_v36, %v452_v37  ;;  %v583_v40 = vld [vmem:[%s755_s2 + $0x38] sm:$0xff]  ;;  %v582_v42 = vld [vmem:[%s755_s2 + $0x30] sm:$0xff]  ;;  %v580_v47 = vld [vmem:[%s755_s2 + $0x20] sm:$0xff] }
   0xd   :  { %406 = vmatpush.bf16.msra.mxu2 %v583_v40  ;;  %v579_v49 = vld [vmem:[%s755_s2 + $0x18] sm:$0xff]  ;;  %v578_v51 = vld [vmem:[%s755_s2 + $0x10] sm:$0xff]  ;;  %v577_v54 = vld [vmem:[%s755_s2 + $0x8] sm:$0xff] }
   0xe   :  { %204 = vmatpush.bf16.msra.mxu0 %v564_v6  ;;  %587 = vmatpush.bf16.msra.mxu3 %v564_v6  ;;  %v576_v56 = vld [vmem:[%s755_s2] sm:$0xff] }
   0xf   :  { %595 = vmatpush.bf16.msra.mxu1 %v572_v7 }
  0x11   :  { %407 = vmatpush.bf16.msra.mxu2 %v582_v42 }
  0x12   :  { %205 = vmatpush.bf16.msra.mxu0 %v563_v8  ;;  %588 = vmatpush.bf16.msra.mxu3 %v563_v8 }
  0x13   :  { %596 = vmatpush.bf16.msra.mxu1 %v571_v9 }
  0x15   :  { %408 = vmatpush.bf16.msra.mxu2 %v581_v44 }
  0x16   :  { %206 = vmatpush.bf16.msra.mxu0 %v562_v10  ;;  %589 = vmatpush.bf16.msra.mxu3 %v562_v10 }
  0x17   :  { %597 = vmatpush.bf16.msra.mxu1 %v570_v11 }
  0x19   :  { %409 = vmatpush.bf16.msra.mxu2 %v580_v47 }
  0x1a   :  { %207 = vmatpush.bf16.msra.mxu0 %v561_v12  ;;  %590 = vmatpush.bf16.msra.mxu3 %v561_v12 }
  0x1b   :  { %598 = vmatpush.bf16.msra.mxu1 %v569_v13 }
  0x1d   :  { %410 = vmatpush.bf16.msra.mxu2 %v579_v49 }
  0x1e   :  { %208 = vmatpush.bf16.msra.mxu0 %v560_v14  ;;  %591 = vmatpush.bf16.msra.mxu3 %v560_v14 }
  0x1f   :  { %599 = vmatpush.bf16.msra.mxu1 %v568_v19 }
  0x21   :  { %214 = vmatmul.bf16.vlgmr.msra.gmra.mxu3 %v435_v22  ;;  %209 = vmatmul.bf16.vlgmr.msra.gmra.mxu0 %v427_v23 }
  0x22   :  { %230 = vmatpush.bf16.msrb.mxu0 %v575_v1  ;;  %243 = vmatmul.bf16.vlgmr.msra.gmra.mxu1 %v439_v24 }
  0x23   :  { %411 = vmatpush.bf16.msra.mxu2 %v578_v51 }
  0x26   :  { %231 = vmatpush.bf16.msrb.mxu0 %v574_v3 }
  0x27   :  { %412 = vmatpush.bf16.msra.mxu2 %v577_v54 }
  0x2a   :  { %232 = vmatpush.bf16.msrb.mxu0 %v573_v5 }
  0x2b   :  { %413 = vmatpush.bf16.msra.mxu2 %v576_v56 }
  0x2e   :  { %233 = vmatpush.bf16.msrb.mxu0 %v572_v7 }
  0x31   :  { %219 = vmatmul.bf16.gmra.mxu3 %v443_v29 }
  0x32   :  { %234 = vmatpush.bf16.msrb.mxu0 %v571_v9  ;;  %248 = vmatmul.bf16.gmra.mxu1 %v447_v30 }
  0x36   :  { %235 = vmatpush.bf16.msrb.mxu0 %v570_v11 }
  0x3a   :  { %236 = vmatpush.bf16.msrb.mxu0 %v569_v13 }
  0x3e   :  { %237 = vmatpush.bf16.msrb.mxu0 %v568_v19 }
  0x41   :  { %238 = vmatmul.bf16.vlgmr.msrb.gmra.mxu0 %v431_v33  ;;  %224 = vmatmul.bf16.gmra.mxu3 %v451_v38 }
  0x42   :  { %253 = vmatmul.bf16.gmra.mxu1 %v455_v39 }
  0x9e   :  { %v210_v46 = vpop.f32.mrf.mxu0 }
  0x9f   :  { %v244_v41 = vpop.f32.mrf.mxu1 }
  0xa4   :  { %v215_v43 = vpop.f32.mrf.mxu3 }
  0xa5   :  { %v245_v57 = vadd.f32 %v244_v41, %v215_v43 }
  0xa6   :  { %v212_v52 = vpop.f32.mrf.mxu0 }
  0xa7   :  { %v246_v45 = vpop.f32.mrf.mxu1  ;;  %v272_v63 = vrot.slane %v245_v57, 4 }
  0xa9   :  { %v273_v5 = vadd.f32 %v272_v63, %v245_v57 }
  0xab   :  { %v274_v14 = vrot.slane %v273_v5, 2 }
  0xac   :  { %v217_v48 = vpop.f32.mrf.mxu3 }
  0xad   :  { %v247_v58 = vadd.f32 %v246_v45, %v217_v48  ;;  %v275_v23 = vadd.f32 %v274_v14, %v273_v5 }
  0xaf   :  { %v249_v50 = vpop.f32.mrf.mxu1  ;;  %v278_v1 = vrot.slane %v247_v58, 4  ;;  %v276_v34 = vrot.slane %v275_v23, 1 }
  0xb1   :  { %v279_v7 = vadd.f32 %v278_v1, %v247_v58  ;;  %v277_v44 = vadd.f32 %v276_v34, %v275_v23 }
  0xb3   :  { %v280_v17 = vrot.slane %v279_v7, 2 }
  0xb4   :  { %v220_v53 = vpop.f32.mrf.mxu3 }
  0xb5   :  { %v250_v59 = vadd.f32 %v249_v50, %v220_v53  ;;  %v281_v26 = vadd.f32 %v280_v17, %v279_v7 }
  0xb7   :  { %v251_v55 = vpop.f32.mrf.mxu1  ;;  %v284_v3 = vrot.slane %v250_v59, 4  ;;  %v282_v37 = vrot.slane %v281_v26, 1 }
  0xb9   :  { %v285_v9 = vadd.f32 %v284_v3, %v250_v59  ;;  %v283_v47 = vadd.f32 %v282_v37, %v281_v26 }
  0xbb   :  { %v286_v19 = vrot.slane %v285_v9, 2 }
  0xbc   :  { %v222_v62 = vpop.f32.mrf.mxu3 }
  0xbd   :  { %v252_v0 = vadd.f32 %v251_v55, %v222_v62  ;;  %v287_v28 = vadd.f32 %v286_v19, %v285_v9 }
  0xbe   :  { %v239_v60 = vpop.f32.mrf.mxu0 }
  0xbf   :  { %v240_v61 = vadd.f32 %v239_v60, %v210_v46  ;;  %v290_v6 = vrot.slane %v252_v0, 4  ;;  %v254_v8 = vpop.f32.mrf.mxu1  ;;  %v288_v39 = vrot.slane %v287_v28, 1 }
  0xc1   :  { %v260_v2 = vrot.slane %v240_v61, 4  ;;  %v291_v15 = vadd.f32 %v290_v6, %v252_v0  ;;  %v289_v49 = vadd.f32 %v288_v39, %v287_v28  ;;  %v600_v0 = vld [vmem:[%s754_s3] ss:$0 sm:$0xff] }
  0xc3   :  { %v261_v4 = vadd.f32 %v260_v2, %v240_v61  ;;  %v292_v24 = vrot.slane %v291_v15, 2 }
  0xc4   :  { %v225_v13 = vpop.f32.mrf.mxu3 }
  0xc5   :  { %v262_v11 = vrot.slane %v261_v4, 2  ;;  %v255_v16 = vadd.f32 %v254_v8, %v225_v13  ;;  %v293_v35 = vadd.f32 %v292_v24, %v291_v15 }
  0xc6   :  { %v241_v10 = vpop.f32.mrf.mxu0 }
  0xc7   :  { %v242_v12 = vadd.f32 %v241_v10, %v212_v52  ;;  %v296_v20 = vrot.slane %v255_v16, 4  ;;  %v263_v21 = vadd.f32 %v262_v11, %v261_v4  ;;  %v256_v32 = vpop.f32.mrf.mxu1  ;;  %v294_v45 = vrot.slane %v293_v35, 1 }
  0xc9   :  { %v266_v18 = vrot.slane %v242_v12, 4  ;;  %v297_v25 = vadd.f32 %v296_v20, %v255_v16  ;;  %v264_v29 = vrot.slane %v263_v21, 1  ;;  %v295_v54 = vadd.f32 %v294_v45, %v293_v35 }
  0xcb   :  { %v267_v22 = vadd.f32 %v266_v18, %v242_v12  ;;  %v298_v31 = vrot.slane %v297_v25, 2  ;;  %v265_v41 = vadd.f32 %v264_v29, %v263_v21 }
  0xcc   :  { %v227_v33 = vpop.f32.mrf.mxu3 }
  0xcd   :  { %v268_v27 = vrot.slane %v267_v22, 2  ;;  %v257_v36 = vadd.f32 %v256_v32, %v227_v33  ;;  %v299_v43 = vadd.f32 %v298_v31, %v297_v25 }
  0xcf   :  { %v269_v30 = vadd.f32 %v268_v27, %v267_v22  ;;  %v302_v40 = vrot.slane %v257_v36, 4  ;;  %v300_v52 = vrot.slane %v299_v43, 1 }
  0xd1   :  { %v270_v38 = vrot.slane %v269_v30, 1  ;;  %v303_v46 = vadd.f32 %v302_v40, %v257_v36  ;;  %v301_v59 = vadd.f32 %v300_v52, %v299_v43 }
  0xd3   :  { %v271_v42 = vadd.f32 %v270_v38, %v269_v30  ;;  %v304_v50 = vrot.slane %v303_v46, 2 }
  0xd5   :  { %v317_v48 = vsel %vm316_vm0, %v271_v42, %v265_v41  ;;  %v305_v55 = vadd.f32 %v304_v50, %v303_v46 }
  0xd6   :  { %v319_v51 = vsel %vm318_vm1, %v277_v44, %v317_v48 }
  0xd7   :  { %v321_v53 = vsel %vm320_vm2, %v283_v47, %v319_v51  ;;  %v306_v57 = vrot.slane %v305_v55, 1 }
  0xd8   :  { %v323_v56 = vsel %vm322_vm3, %v289_v49, %v321_v53 }
  0xd9   :  { %v325_v58 = vsel %vm324_vm4, %v295_v54, %v323_v56  ;;  %v307_v60 = vadd.f32 %v306_v57, %v305_v55 }
  0xda   :  { %v327_v61 = vsel %vm326_vm5, %v301_v59, %v325_v58 }
  0xdb   :  { %v329_v62 = vsel %vm328_vm6, %v307_v60, %v327_v61 }
  0xdc   :  { %v337_v63 = vpack.c.bf16 %v329_v62, %v329_v62 }
  0xde   :  { %414 = vmatmul.bf16.vlgmr.msra.gmra.mxu2 %v337_v63 }
 0x161   :  { %v415_v1 = vpop.f32.mrf.mxu2 }
 0x162   :  { %v416_v2 = vadd.f32 %v600_v0, %v415_v1 }
 0x164   :  { %419 = vst [vmem:[%s756_s4] sm:$0xff] %v416_v2 }
 0x169   :  { %v417_v3 = vpop.f32.mrf.mxu2 }

</bundles_post_ra>
